<compile_context>
chip_gen: v7x
topology: tpu7x:2x2x1
jax: 0.10.0
libtpu: 0.0.40
codegen_flags: <defaults>
</compile_context>

<pallas_src>
import functools
import math

import jax
import jax.numpy as jnp
from jax.experimental import pallas as pl
from jax.experimental.pallas import tpu as pltpu

LANE = 128


def _round_up(n, m):
    return ((n + m - 1) // m) * m


def _sublane_multiple(*dtypes):
    # Sub-32-bit dtypes pack along sublanes (bf16 vreg = 16x128, int8 = 32x128):
    # round batch tiles so packed vregs / stores stay full.
    mults = [32 // jnp.dtype(d).itemsize for d in dtypes]
    return max(8, *mults)


# ---------------------------------------------------------------------------
# Kernel: one batch tile through the whole (small, VMEM-resident) MLP.
# refs = (x_ref, w0, b0, w1, b1, ..., out_ref)
# ---------------------------------------------------------------------------
def _mlp_kernel(num_hidden_layers, has_head, compute_dtype, *refs):
    x_ref = refs[0]
    o_ref = refs[-1]
    p_refs = refs[1:-1]

    # Cast to the MXU-native parameter dtype inside the kernel (x was DMA'd in
    # its native dtype; no extra wrapper-side HBM pass).
    h = x_ref[...].astype(compute_dtype)
    idx = 0
    for _ in range(num_hidden_layers):
        w = p_refs[idx][...]
        b = p_refs[idx + 1][...]
        idx += 2
        acc = jnp.dot(h, w, preferred_element_type=jnp.float32)   # f32 MXU accum
        acc = acc + b.astype(jnp.float32)                         # bias add in f32
        # ReLU in the compute dtype (bf16 VALU on v6e/v7x halves vreg traffic;
        # identical result when compute dtype is f32). ReLU/round commute.
        h = jnp.maximum(acc.astype(compute_dtype), 0)
        # Dropout(p): identity in eval mode.
    if has_head:
        w = p_refs[idx][...]
        b = p_refs[idx + 1][...]
        acc = jnp.dot(h, w, preferred_element_type=jnp.float32)
        h = acc + b.astype(jnp.float32)
    o_ref[...] = h.astype(o_ref.dtype)


# ---------------------------------------------------------------------------
# Parameter construction (deterministic, PyTorch-Linear-style uniform init).
# Weights stored [in_features, out_features] (x @ W + b layout), zero-padded on
# both feature axes to multiples of 128 lanes. Biases kept as [1, out_pad]
# rows. Padded entries are exactly zero => logits unchanged.
# Hidden Linears always have bias (PyTorch default); only the head honors
# the `bias` argument, matching the module spec.
# ---------------------------------------------------------------------------
def init_classifier_mlp_params(key, in_ch, num_classes, layers_description,
                               bias=True, dtype=jnp.float32):
    params = []  # flat list: [w0, b0, w1, b1, ...]
    last = in_ch
    sizes = list(layers_description) + ([num_classes] if num_classes is not None else [])
    for li, out in enumerate(sizes):
        is_head = (num_classes is not None) and (li == len(sizes) - 1)
        use_bias = bias if is_head else True
        key, kw, kb = jax.random.split(key, 3)
        k_pad = _round_up(last, LANE)
        n_pad = _round_up(out, LANE)
        bound = 1.0 / math.sqrt(last)
        w = jax.random.uniform(kw, (last, out), jnp.float32, -bound, bound)
        w = jnp.pad(w, ((0, k_pad - last), (0, n_pad - out)))
        if use_bias:
            b = jax.random.uniform(kb, (1, out), jnp.float32, -bound, bound)
            b = jnp.pad(b, ((0, 0), (0, n_pad - out)))
        else:
            b = jnp.zeros((1, n_pad), jnp.float32)
        params += [w.astype(dtype), b.astype(dtype)]
        last = out
    return params, last   # `last` = logical (unpadded) output feature count


# ---------------------------------------------------------------------------
# Wrapper
# ---------------------------------------------------------------------------
def classifier_mlp_forward(x, params, num_hidden_layers, has_head, num_out,
                           *, tile_b=256):
    assert params, "ClassifierMLP with no layers is an identity; nothing to run."
    batch, in_ch = x.shape
    compute_dtype = params[0].dtype
    in_pad = params[0].shape[0]
    out_pad = params[-1].shape[1]

    # --- dtype-aware batch tiling (sublane packing) ---
    sub = _sublane_multiple(x.dtype, compute_dtype)
    tile_b = max(sub, _round_up(tile_b, sub))
    tile_b = min(tile_b, _round_up(batch, sub))

    # --- device-aware VMEM budget ---
    try:
        vmem_cap = int(pltpu.get_tpu_info().vmem_capacity_bytes)
    except Exception:
        vmem_cap = 64 * 1024 * 1024          # conservative (v7x per-TensorCore)
    vmem_soft_cap = int(0.8 * vmem_cap)

    itemsize_x = jnp.dtype(x.dtype).itemsize
    param_bytes = sum(p.size * p.dtype.itemsize for p in params)
    widths = [in_pad] + [params[2 * i].shape[1] for i in range(len(params) // 2)]

    def _need(tb, param_factor):
        io = 2 * tb * (in_pad + out_pad) * itemsize_x        # double-buffered x/out tiles
        act = 4 * tb * max(widths) * 4                       # f32 acc + retiling temporaries
        return param_factor * param_bytes + io + act

    # Shrink the batch tile if a full tile would not fit the VMEM budget.
    while tile_b > sub and int(1.5 * _need(tile_b, 1)) + (2 << 20) > vmem_soft_cap:
        tile_b = max(sub, _round_up(tile_b // 2, sub))
    # TODO(synk): if param_bytes alone exceeds VMEM (very wide layers on v7x),
    # stream weights from HBM (memory_space=pl.ANY + pltpu.emit_pipeline) instead
    # of keeping them VMEM-resident.

    b_pad = _round_up(batch, tile_b)
    x_p = x
    if b_pad != batch or in_pad != in_ch:
        # Pad only when needed; no wrapper-side dtype cast (done in-kernel).
        x_p = jnp.pad(x, ((0, b_pad - batch), (0, in_pad - in_ch)))

    grid = (b_pad // tile_b,)
    x_spec = pl.BlockSpec((tile_b, in_pad), lambda i: (i, 0))
    out_spec = pl.BlockSpec((tile_b, out_pad), lambda i: (i, 0))

    flops = 2 * b_pad * sum(params[2 * i].shape[0] * params[2 * i].shape[1]
                            for i in range(len(params) // 2))
    bytes_accessed = (param_bytes + x_p.size * itemsize_x
                      + b_pad * out_pad * itemsize_x)

    kernel = functools.partial(_mlp_kernel, num_hidden_layers, has_head, compute_dtype)

    def _run(param_specs, param_factor):
        vmem_limit = min(int(1.5 * _need(tile_b, param_factor)) + (2 << 20),
                         vmem_soft_cap)
        vmem_limit = max(vmem_limit, 4 << 20)
        return pl.pallas_call(
            kernel,
            out_shape=jax.ShapeDtypeStruct((b_pad, out_pad), x.dtype),
            grid=grid,
            in_specs=[x_spec] + param_specs,
            out_specs=out_spec,
            compiler_params=pltpu.CompilerParams(
                # NOTE(v7x): use pltpu.CORE_PARALLEL on the batch axis (or a
                # pl.core_map tensorcore mesh) if "parallel" alone does not
                # shard the batch grid across the 2 TensorCores.
                dimension_semantics=("parallel",),
                vmem_limit_bytes=vmem_limit,
            ),
            cost_estimate=pl.CostEstimate(
                flops=flops, transcendentals=0, bytes_accessed=bytes_accessed),
        )(x_p, *params)

    try:
        # Weights/biases: full-array blocks, constant index_map, single buffer
        # -> one VMEM-resident copy shared by every batch tile.
        param_specs = [pl.BlockSpec(p.shape, lambda i: (0, 0),
                                    pipeline_mode=pl.Buffered(1)) for p in params]
        out_padded = _run(param_specs, param_factor=1)
    except Exception:
        # Fallback for Pallas versions without single-buffered pipeline_mode.
        param_specs = [pl.BlockSpec(p.shape, lambda i: (0, 0)) for p in params]
        out_padded = _run(param_specs, param_factor=2)

    # Slice padded batch rows / padded logit columns back to logical shape.
    return out_padded[:batch, :num_out]


# ---------------------------------------------------------------------------
# Pure-JAX reference (same padded parameters, f32 math, highest precision)
# ---------------------------------------------------------------------------
def classifier_mlp_ref(x, params, num_hidden_layers, has_head, num_out):
    in_pad = params[0].shape[0]
    h = jnp.pad(x, ((0, 0), (0, in_pad - x.shape[1]))).astype(jnp.float32)
    idx = 0
    hp = jax.lax.Precision.HIGHEST
    for _ in range(num_hidden_layers):
        h = jnp.maximum(jnp.dot(h, params[idx].astype(jnp.float32), precision=hp)
                        + params[idx + 1].astype(jnp.float32), 0.0)
        idx += 2
    if has_head:
        h = (jnp.dot(h, params[idx].astype(jnp.float32), precision=hp)
             + params[idx + 1].astype(jnp.float32))
    return h[:, :num_out].astype(x.dtype)


if __name__ == "__main__":
    # Module config: ClassifierMLP(in_ch=32, num_classes=10,
    #                              layers_description=(64,), dropout_rate=0.1)
    in_ch = 32
    num_classes = 10
    layers_description = (64,)
    batch = 32

    key = jax.random.PRNGKey(0)
    key, kx = jax.random.split(key)
    x = jax.random.normal(kx, (batch, in_ch), jnp.float32)

    num_hidden_layers = len(layers_description)
    has_head = num_classes is not None

    # ---- f32 parameters (tight numerical check; multi-step batch grid) ----
    params_f32, num_out = init_classifier_mlp_params(
        key, in_ch, num_classes, layers_description, bias=True, dtype=jnp.float32)
    # tile_b=8 exercises a multi-step (pipelined, parallel) batch grid at this
    # small demo size; production callers should use the 256-row default.
    out = classifier_mlp_forward(
        x, params_f32, num_hidden_layers, has_head, num_out, tile_b=8)
    out = jax.block_until_ready(out)
    ref = classifier_mlp_ref(x, params_f32, num_hidden_layers, has_head, num_out)
    assert out.shape == (batch, num_classes), out.shape
    assert jnp.allclose(out, ref, atol=2e-3, rtol=2e-3), \
        float(jnp.max(jnp.abs(out - ref)))

    # ---- bf16 parameters (MXU-native path on v5e/v6e/v7x; exercises the
    # 16-row sublane-packed batch tiling). Loose tolerance vs f32 reference.
    params_bf16 = [p.astype(jnp.bfloat16) for p in params_f32]
    out_bf = classifier_mlp_forward(
        x, params_bf16, num_hidden_layers, has_head, num_out, tile_b=16)
    out_bf = jax.block_until_ready(out_bf)
    assert out_bf.shape == (batch, num_classes), out_bf.shape
    assert jnp.allclose(out_bf.astype(jnp.float32), ref, atol=1e-1, rtol=1e-1), \
        float(jnp.max(jnp.abs(out_bf.astype(jnp.float32) - ref)))

    print("KERNEL_OK")
</pallas_src>

<mosaic_0001>
module attributes {stable_mosaic.version = 11 : i64} {
  func.func @_mlp_kernel(%arg0: i32, %arg1: memref<8x128xf32, #tpu.memory_space<vmem>>, %arg2: memref<128x128xf32, #tpu.memory_space<vmem>>, %arg3: memref<1x128xf32, #tpu.memory_space<vmem>>, %arg4: memref<128x128xf32, #tpu.memory_space<vmem>>, %arg5: memref<1x128xf32, #tpu.memory_space<vmem>>, %arg6: memref<8x128xf32, #tpu.memory_space<vmem>>) attributes {dimension_semantics = [#tpu.dimension_semantics<parallel>], iteration_bounds = array<i64: 4>, scalar_prefetch = 0 : i64, scratch_operands = 0 : i64, tpu.core_type = #tpu.core_type<tc>, window_params = [{transform_indices = @transform_0, window_bounds = array<i64: 8, 128>}, {pipeline_mode = #tpu.pipeline_mode<synchronous>, transform_indices = @transform_1, window_bounds = array<i64: 128, 128>}, {pipeline_mode = #tpu.pipeline_mode<synchronous>, transform_indices = @transform_2, window_bounds = array<i64: 1, 128>}, {pipeline_mode = #tpu.pipeline_mode<synchronous>, transform_indices = @transform_3, window_bounds = array<i64: 128, 128>}, {pipeline_mode = #tpu.pipeline_mode<synchronous>, transform_indices = @transform_4, window_bounds = array<i64: 1, 128>}, {transform_indices = @transform_5, window_bounds = array<i64: 8, 128>}]} {
    %c0 = arith.constant 0 : index
    %c0_0 = arith.constant 0 : index
    %0 = vector.load %arg1[%c0, %c0_0] : memref<8x128xf32, #tpu.memory_space<vmem>>, vector<8x128xf32>
    %c0_1 = arith.constant 0 : index
    %c0_2 = arith.constant 0 : index
    %1 = vector.load %arg2[%c0_1, %c0_2] : memref<128x128xf32, #tpu.memory_space<vmem>>, vector<128x128xf32>
    %c0_3 = arith.constant 0 : index
    %c0_4 = arith.constant 0 : index
    %2 = vector.load %arg3[%c0_3, %c0_4] : memref<1x128xf32, #tpu.memory_space<vmem>>, vector<1x128xf32>
    %cst = arith.constant dense<0.000000e+00> : vector<8x128xf32>
    %3 = tpu.matmul %0, %1, %cst {dimension_numbers = #tpu.dot_dimension_numbers<[1], [0], [0], [1], [0, 0, 1, 1], [], []>} : vector<8x128xf32>, vector<128x128xf32>, vector<8x128xf32> -> vector<8x128xf32>
    %4 = vector.broadcast %2 : vector<1x128xf32> to vector<8x128xf32>
    %5 = arith.addf %3, %4 : vector<8x128xf32>
    %cst_5 = arith.constant 0.000000e+00 : f32
    %6 = vector.broadcast %cst_5 : f32 to vector<8x128xf32>
    %7 = arith.maximumf %5, %6 : vector<8x128xf32>
    %c0_6 = arith.constant 0 : index
    %c0_7 = arith.constant 0 : index
    %8 = vector.load %arg4[%c0_6, %c0_7] : memref<128x128xf32, #tpu.memory_space<vmem>>, vector<128x128xf32>
    %c0_8 = arith.constant 0 : index
    %c0_9 = arith.constant 0 : index
    %9 = vector.load %arg5[%c0_8, %c0_9] : memref<1x128xf32, #tpu.memory_space<vmem>>, vector<1x128xf32>
    %cst_10 = arith.constant dense<0.000000e+00> : vector<8x128xf32>
    %10 = tpu.matmul %7, %8, %cst_10 {dimension_numbers = #tpu.dot_dimension_numbers<[1], [0], [0], [1], [0, 0, 1, 1], [], []>} : vector<8x128xf32>, vector<128x128xf32>, vector<8x128xf32> -> vector<8x128xf32>
    %11 = vector.broadcast %9 : vector<1x128xf32> to vector<8x128xf32>
    %12 = arith.addf %10, %11 : vector<8x128xf32>
    %c0_11 = arith.constant 0 : index
    %c0_12 = arith.constant 0 : index
    %13 = vector.load %arg6[%c0_11, %c0_12] : memref<8x128xf32, #tpu.memory_space<vmem>>, vector<8x128xf32>
    tpu.vector_store %arg6[%c0_11, %c0_12], %12 {strides = array<i32>} : memref<8x128xf32, #tpu.memory_space<vmem>>, vector<8x128xf32>,
    return
  }
  func.func @transform_0(%arg0: i32) -> (i32, i32) {
    %c0_i32 = arith.constant 0 : i32
    %c0_i32_0 = arith.constant 0 : i32
    return %arg0, %c0_i32 : i32, i32
  }
  func.func @transform_1(%arg0: i32) -> (i32, i32) {
    %c0_i32 = arith.constant 0 : i32
    %c0_i32_0 = arith.constant 0 : i32
    %c0_i32_1 = arith.constant 0 : i32
    return %c0_i32, %c0_i32_0 : i32, i32
  }
  func.func @transform_2(%arg0: i32) -> (i32, i32) {
    %c0_i32 = arith.constant 0 : i32
    %c0_i32_0 = arith.constant 0 : i32
    %c0_i32_1 = arith.constant 0 : i32
    return %c0_i32, %c0_i32_0 : i32, i32
  }
  func.func @transform_3(%arg0: i32) -> (i32, i32) {
    %c0_i32 = arith.constant 0 : i32
    %c0_i32_0 = arith.constant 0 : i32
    %c0_i32_1 = arith.constant 0 : i32
    return %c0_i32, %c0_i32_0 : i32, i32
  }
  func.func @transform_4(%arg0: i32) -> (i32, i32) {
    %c0_i32 = arith.constant 0 : i32
    %c0_i32_0 = arith.constant 0 : i32
    %c0_i32_1 = arith.constant 0 : i32
    return %c0_i32, %c0_i32_0 : i32, i32
  }
  func.func @transform_5(%arg0: i32) -> (i32, i32) {
    %c0_i32 = arith.constant 0 : i32
    %c0_i32_0 = arith.constant 0 : i32
    return %arg0, %c0_i32 : i32, i32
  }
}

module attributes {stable_mosaic.version = 11 : i64} {
  func.func @_mlp_kernel(%arg0: i32, %arg1: memref<8x128xf32, #tpu.memory_space<vmem>>, %arg2: memref<128x128xf32, #tpu.memory_space<vmem>>, %arg3: memref<1x128xf32, #tpu.memory_space<vmem>>, %arg4: memref<128x128xf32, #tpu.memory_space<vmem>>, %arg5: memref<1x128xf32, #tpu.memory_space<vmem>>, %arg6: memref<8x128xf32, #tpu.memory_space<vmem>>) attributes {dimension_semantics = [#tpu.dimension_semantics<parallel>], iteration_bounds = array<i64: 4>, scalar_prefetch = 0 : i64, scratch_operands = 0 : i64, tpu.core_type = #tpu.core_type<tc>, window_params = [{transform_indices = @transform_0, window_bounds = array<i64: 8, 128>}, {pipeline_mode = #tpu.pipeline_mode<synchronous>, transform_indices = @transform_1, window_bounds = array<i64: 128, 128>}, {pipeline_mode = #tpu.pipeline_mode<synchronous>, transform_indices = @transform_2, window_bounds = array<i64: 1, 128>}, {pipeline_mode = #tpu.pipeline_mode<synchronous>, transform_indices = @transform_3, window_bounds = array<i64: 128, 128>}, {pipeline_mode = #tpu.pipeline_mode<synchronous>, transform_indices = @transform_4, window_bounds = array<i64: 1, 128>}, {transform_indices = @transform_5, window_bounds = array<i64: 8, 128>}]} {
    %c0 = arith.constant 0 : index
    %c0_0 = arith.constant 0 : index
    %0 = vector.load %arg1[%c0, %c0_0] : memref<8x128xf32, #tpu.memory_space<vmem>>, vector<8x128xf32>
    %c0_1 = arith.constant 0 : index
    %c0_2 = arith.constant 0 : index
    %1 = vector.load %arg2[%c0_1, %c0_2] : memref<128x128xf32, #tpu.memory_space<vmem>>, vector<128x128xf32>
    %c0_3 = arith.constant 0 : index
    %c0_4 = arith.constant 0 : index
    %2 = vector.load %arg3[%c0_3, %c0_4] : memref<1x128xf32, #tpu.memory_space<vmem>>, vector<1x128xf32>
    %cst = arith.constant dense<0.000000e+00> : vector<8x128xf32>
    %3 = tpu.matmul %0, %1, %cst {dimension_numbers = #tpu.dot_dimension_numbers<[1], [0], [0], [1], [0, 0, 1, 1], [], []>} : vector<8x128xf32>, vector<128x128xf32>, vector<8x128xf32> -> vector<8x128xf32>
    %4 = vector.broadcast %2 : vector<1x128xf32> to vector<8x128xf32>
    %5 = arith.addf %3, %4 : vector<8x128xf32>
    %cst_5 = arith.constant 0.000000e+00 : f32
    %6 = vector.broadcast %cst_5 : f32 to vector<8x128xf32>
    %7 = arith.maximumf %5, %6 : vector<8x128xf32>
    %c0_6 = arith.constant 0 : index
    %c0_7 = arith.constant 0 : index
    %8 = vector.load %arg4[%c0_6, %c0_7] : memref<128x128xf32, #tpu.memory_space<vmem>>, vector<128x128xf32>
    %c0_8 = arith.constant 0 : index
    %c0_9 = arith.constant 0 : index
    %9 = vector.load %arg5[%c0_8, %c0_9] : memref<1x128xf32, #tpu.memory_space<vmem>>, vector<1x128xf32>
    %cst_10 = arith.constant dense<0.000000e+00> : vector<8x128xf32>
    %10 = tpu.matmul %7, %8, %cst_10 {dimension_numbers = #tpu.dot_dimension_numbers<[1], [0], [0], [1], [0, 0, 1, 1], [], []>} : vector<8x128xf32>, vector<128x128xf32>, vector<8x128xf32> -> vector<8x128xf32>
    %11 = vector.broadcast %9 : vector<1x128xf32> to vector<8x128xf32>
    %12 = arith.addf %10, %11 : vector<8x128xf32>
    %c0_11 = arith.constant 0 : index
    %c0_12 = arith.constant 0 : index
    %13 = vector.load %arg6[%c0_11, %c0_12] : memref<8x128xf32, #tpu.memory_space<vmem>>, vector<8x128xf32>
    tpu.vector_store %arg6[%c0_11, %c0_12], %12 {strides = array<i32>} : memref<8x128xf32, #tpu.memory_space<vmem>>, vector<8x128xf32>,
    return
  }
  func.func @transform_0(%arg0: i32) -> (i32, i32) {
    %c0_i32 = arith.constant 0 : i32
    %c0_i32_0 = arith.constant 0 : i32
    return %arg0, %c0_i32 : i32, i32
  }
  func.func @transform_1(%arg0: i32) -> (i32, i32) {
    %c0_i32 = arith.constant 0 : i32
    %c0_i32_0 = arith.constant 0 : i32
    %c0_i32_1 = arith.constant 0 : i32
    return %c0_i32, %c0_i32_0 : i32, i32
  }
  func.func @transform_2(%arg0: i32) -> (i32, i32) {
    %c0_i32 = arith.constant 0 : i32
    %c0_i32_0 = arith.constant 0 : i32
    %c0_i32_1 = arith.constant 0 : i32
    return %c0_i32, %c0_i32_0 : i32, i32
  }
  func.func @transform_3(%arg0: i32) -> (i32, i32) {
    %c0_i32 = arith.constant 0 : i32
    %c0_i32_0 = arith.constant 0 : i32
    %c0_i32_1 = arith.constant 0 : i32
    return %c0_i32, %c0_i32_0 : i32, i32
  }
  func.func @transform_4(%arg0: i32) -> (i32, i32) {
    %c0_i32 = arith.constant 0 : i32
    %c0_i32_0 = arith.constant 0 : i32
    %c0_i32_1 = arith.constant 0 : i32
    return %c0_i32, %c0_i32_0 : i32, i32
  }
  func.func @transform_5(%arg0: i32) -> (i32, i32) {
    %c0_i32 = arith.constant 0 : i32
    %c0_i32_0 = arith.constant 0 : i32
    return %arg0, %c0_i32 : i32, i32
  }
}

</mosaic_0001>

<bundles_post_ra>
// kernel: tpu_custom_call.1
= control target key start
LH: loop header
LB: loop body
LE: loop exit
PB: predicated region body
PF: predicated region fallthrough
CT: control target
= control target key end

     0   :  { %10 = vsyncpa [#allocation3], 0  ;;  %s1249_s0 = inlined_call_operand.hbm [shape: f32[32,128], index: 0, kind: input, shape index: {}]   ;;  %s1250_s1 = inlined_call_operand.hbm [shape: f32[128,128], index: 1, kind: input, shape index: {}]   ;;  %s1251_s2 = inlined_call_operand.vmem [shape: f32[1,128], index: 2, kind: input, shape index: {}]   ;;  %s1252_s3 = inlined_call_operand.hbm [shape: f32[128,128], index: 3, kind: input, shape index: {}]   ;;  %s1253_s4 = inlined_call_operand.vmem [shape: f32[1,128], index: 4, kind: input, shape index: {}]   ;;  %s1254_s5 = inlined_call_operand.hbm [shape: f32[32,128], index: 5, kind: output, shape index: {}]  }
   0x1   :  { %12 = vsyncpa [#allocation3 + $0x1], 0 }
   0x2   :  { %13 = vsyncpa [#allocation6], 0 }
   0x3   :  { %14 = vsyncpa [#allocation4], 0 }
   0x4   :  { %16 = vsyncpa [#allocation4 + $0x1], 0  ;;  %s1000_s18 = smov 0   ;;  %s1002_s19 = smov 0  }
   0x5   :  { %s1004_s20 = smov 0   ;;  %s1006_s21 = smov 0  }
   0x6 LB: > { %s1021_s22 = sadd.s32 4294967295, %s959_s21   ;;  %s561_s23 = sadd.s32 4294967294, %s959_s21   ;;  %s959_s21 = sphi %s1006_s21, %s1273_s21   ;;  %s955_s20 = sphi %s1004_s20, %s1272_s20   ;;  %s951_s19 = sphi %s1002_s19, %s1271_s19   ;;  %s947_s18 = sphi %s1000_s18, %s1270_s18  }
   0x7   : > { %p42_p0 = scmp.ne.s32.totalorder %s951_s19, %s947_s18  ;;  %p1255_p1 = scmp.eq.s32.totalorder %s1021_s22, 0 }
   0x8   : > { %p156_p3 = scmp.eq.s32.totalorder %s561_s23, 3  ;;  %p562_p5 = scmp.ge.s32.totalorder %s959_s21, 1 }
   0x9   : > { %p1030_p4 = por %p1255_p1, %p42_p0  ;;  %p163_p7 = scmp.lt.s32.totalorder %s959_s21, 5 }
   0xa   : > { %p1035_p6 = por %p156_p3, %p42_p0  ;;  %s961_s27 = smov [#allocation5]  }
   0xb   : > { %s1258_s24 = scalar_select %p1030_p4, 1, 0 }
   0xc   : > { %s1259_s25 = scalar_select %p1035_p6, 1, 0 }
   0xd   : > { %p1040_p8 = pnand %p562_p5, %p163_p7  ;;  %s175_s28 = sshll.u32 %s961_s27, 4  ;;  %s176_s28 = int_to_ptr.vmem [resolvable:$true] %s175_s28 }
   0xe   : > { %s962_s30 = smov [#allocation7]   ;;  %s803_s9 = scalar_lea.hbm %s1250_s1, 2048 }
   0xf   : > { %s1260_s26 = scalar_select %p1040_p8, 1, 0 }
  0x10   : > { %p743_p9 = pneg %p1040_p8  ;;  %s191_s6 = sshll.u32 %s962_s30, 4  ;;  %s1052_s6 = int_to_ptr.vmem [resolvable:$true] %s191_s6 }
  0x11   : > { %p804_p11 = scmp.ne.s32.totalorder %s1250_s1, %s803_s9  ;;  %p810_p3 = scmp.lt.u32.totalorder %s803_s9, %s1250_s1 }
  0x12   : > { %p1048_p10 = pnand %p743_p9, %p1255_p1 }
  0x14   : > { %p805_p12 = pneg %p1048_p10 }
  0x16   : > { %p806_p13 = pnand %p805_p12, %p804_p11 }
  0x18   : > { %p807_p0 = pneg %p806_p13 }
  0x1a   : > { %p812_p5 = pnand %p810_p3, %p807_p0 }
  0x1c   : > { %815 = shalt.err (!%p812_p5)
}
  0x1d   : > { %s816_s14 = scalar_lea.vmem %s176_s28, 2048  ;;  %p824_p2 = scmp.lt.s32.totalorder %s176_s28, %s176_s28 }
  0x1e   : > { %p817_p7 = scmp.ne.s32.totalorder %s176_s28, %s816_s14  ;;  %p825_p6 = scmp.lt.s32.totalorder %s816_s14, %s816_s14 }
  0x20   : > { %p819_p9 = pnand %p817_p7, %p805_p12  ;;  %p826_p4 = por %p825_p6, %p824_p2 }
  0x22   : > { %p820_p1 = pneg %p819_p9 }
  0x24   : > { %p827_p8 = pnand %p826_p4, %p820_p1 }
  0x26   : > { %830 = shalt.err (!%p827_p8)
}
  0x27   : > { %s963_s15 = smov 128   ;;  %s964_s16 = smov 8  }
  0x28   : > { %746 = dma.hbm_to_vmem [thread:$0]  (!%p1048_p10), %s1250_s1, 2048, %s176_s28, [#allocation6], %s963_s15, %s963_s15, %s964_s16  }
  0x29   : > { %s831_s7 = scalar_lea.hbm %s1252_s3, 2048 }
  0x2a   : > { %p832_p11 = scmp.ne.s32.totalorder %s1252_s3, %s831_s7  ;;  %p838_p4 = scmp.lt.u32.totalorder %s831_s7, %s1252_s3 }
  0x2c   : > { %p834_p1 = pnand %p832_p11, %p805_p12 }
  0x2e   : > { %p835_p2 = pneg %p834_p1 }
  0x30   : > { %p840_p6 = pnand %p838_p4, %p835_p2 }
  0x32   : > { %843 = shalt.err (!%p840_p6)
}
  0x33   : > { %s844_s28 = scalar_lea.vmem %s1052_s6, 2048  ;;  %p852_p3 = scmp.lt.s32.totalorder %s1052_s6, %s1052_s6 }
  0x34   : > { %p845_p8 = scmp.ne.s32.totalorder %s1052_s6, %s844_s28  ;;  %p853_p5 = scmp.lt.s32.totalorder %s844_s28, %s844_s28 }
  0x36   : > { %p847_p13 = pnand %p845_p8, %p805_p12  ;;  %p854_p7 = por %p853_p5, %p852_p3 }
  0x38   : > { %p848_p0 = pneg %p847_p13 }
  0x3a   : > { %p855_p9 = pnand %p854_p7, %p848_p0 }
  0x3c   : > { %858 = shalt.err (!%p855_p9)
}
  0x3d   : > { %749 = dma.hbm_to_vmem [thread:$0]  (!%p1048_p10), %s1252_s3, 2048, %s1052_s6, [#allocation6], %s963_s15, %s963_s15, %s964_s16  }
  0x3e   : > { %s1102_s14 = sadd.s32 1, %s959_s21   ;;  %s29_s29 = sadd.s32 1, %s955_s20 }
  0x3f   : > { %s26_s17 = ssub.s32 %s959_s21, %s1102_s14  ;;  %p36_p12 = scmp.ne.s32.totalorder %s955_s20, %s951_s19 }
  0x40   : > { %p27_p11 = scmp.eq.s32.totalorder %s26_s17, 0  ;;  %p37_p1 = scmp.eq.s32.totalorder %s959_s21, 0 }
  0x41   : > { %p1262_p2 = scmp.eq.s32.totalorder %s1021_s22, 3  ;;  %p760_p6 = scmp.lt.s32.totalorder %s959_s21, 4 }
  0x42   : > { %s1118_s27 = scalar_select %p27_p11, %s955_s20, %s29_s29  }
  0x43   : > { %p1112_p4 = por %p1262_p2, %p36_p12  ;;  %p38_p8 = por %p37_p1, %p36_p12 }
  0x44   : > { %s208_s30 = sand.u32 1, %s955_s20   ;;  %s567_s6 = sshll.u32 %s959_s21, 7 }
  0x45   : > { %s566_s7 = sshll.u32 %s208_s30, 3  ;;  %s1125_s8 = scalar_lea.hbm %s1249_s0, %s567_s6 }
  0x46   : > { %s212_s9 = scalar_lea.vmem [#allocation2], %s566_s7  ;;  %p1129_p10 = pnand %p760_p6, %p38_p8 }
  0x47   : > { %s219_s10 = sshll.u32 %s212_s9, 4  ;;  %s209_s28 = scalar_lea.sflag [#allocation3], %s208_s30  ;;  %s1127_s10 = int_to_ptr.vmem [resolvable:$true] %s219_s10 }
  0x48   : > { %s859_s12 = scalar_lea.hbm %s1125_s8, 128  ;;  %p861_p0 = pneg %p1129_p10 }
  0x49   : > { %p860_p13 = scmp.ne.s32.totalorder %s1125_s8, %s859_s12  ;;  %s864_s17 = scalar_lea.hbm %s1249_s0, 512 }
  0x4a   : > { %p865_p7 = scmp.lt.u32.totalorder %s1125_s8, %s1249_s0  ;;  %p866_p9 = scmp.lt.u32.totalorder %s864_s17, %s859_s12 }
  0x4b   : > { %p862_p3 = pnand %p861_p0, %p860_p13  ;;  %p868_p11 = scmp.lt.u32.totalorder %s859_s12, %s1125_s8 }
  0x4c   : > { %p867_p12 = por %p866_p9, %p865_p7 }
  0x4d   : > { %p863_p5 = pneg %p862_p3 }
  0x4e   : > { %p869_p1 = por %p868_p11, %p867_p12 }
  0x50   : > { %p870_p2 = pnand %p869_p1, %p863_p5 }
  0x52   : > { %873 = shalt.err (!%p870_p2)
}
  0x53   : > { %s874_s30 = scalar_lea.vmem %s1127_s10, 128  ;;  %s965_s15 = smov [#allocation2]  }
  0x54   : > { %p875_p6 = scmp.ne.s32.totalorder %s1127_s10, %s874_s30  ;;  %s879_s16 = sshll.u32 %s965_s15, 4  ;;  %s880_s16 = int_to_ptr.vmem [resolvable:$false] %s879_s16 }
  0x55   : > { %s881_s9 = scalar_lea.vmem %s880_s16, 256  ;;  %p882_p3 = scmp.lt.s32.totalorder %s1127_s10, %s880_s16 }
  0x56   : > { %p877_p8 = pnand %p875_p6, %p861_p0  ;;  %p883_p7 = scmp.lt.s32.totalorder %s881_s9, %s874_s30 }
  0x58   : > { %p878_p13 = pneg %p877_p8  ;;  %p884_p9 = por %p883_p7, %p882_p3 }
  0x5a   : > { %p885_p12 = pnand %p884_p9, %p878_p13 }
  0x5c   : > { %888 = shalt.err (!%p885_p12)
}
  0x5d   : > { %753 = dma.hbm_to_vmem [thread:$0]  (!%p1129_p10), %s1125_s8, 128, %s1127_s10, %s209_s28  }
  0x5e   : > { %p1265_p5 = scmp.ne.s32.totalorder %s1260_s26, 0 }
  0x5f   : > { %s1161_s12 = sand.u32 (!%p1265_p5), 1, %s951_s19   ;;  %p1266_p0 = scmp.ne.s32.totalorder (!%p1265_p5), %s1258_s24, 0 }
  0x60   : > { %228 = sbr.rel (%p1265_p5) target bundleno = 585 (0x249), region = 40  ;;  %s569_s13 = sshll.u32 (!%p1265_p5), %s1161_s12, 3 }
  0x61   : > { %s231_s29 = scalar_lea.sflag (!%p1265_p5), [#allocation3], %s1161_s12  ;;  %s1167_s17 = scalar_lea.vmem (!%p1265_p5), [#allocation2], %s569_s13 }
  0x67   : > { %934 = dma.done.wait (%p1266_p0), %s231_s29, 128  }
  0x68   : > { %936 = vsyncadd (%p1266_p0), %s231_s29, 4294967168  ;;  %p1267_p10 = scmp.eq.s32.totalorder %s1021_s22, 0 }
  0x6a   : > { %938 = dma.done.wait (%p1267_p10), [#allocation6], 4096   ;;  %p1268_p11 = pmov %p1267_p10 }
  0x6b   : > { %v966_v0 = vmov 0.0|0.0   ;;  %vm967_vm0 = vmmov 0   ;;  %v968_v1 = vmov 0.0   ;;  %v270_v2 = vld [vmem:[#allocation5] sm:$0xff]  ;;  %v271_v3 = vld [vmem:[#allocation5 + $0x8] sm:$0xff]  ;;  %v272_v4 = vld [vmem:[#allocation5 + $0x10] sm:$0xff] }
  0x6c   : > { %940 = vsyncadd (%p1268_p11), [#allocation6], 4294963200  ;;  %683 = vmatprep.subr.bf16.mxu0 %v966_v0  ;;  %645 = vmatprep.mubr.msk.f32.mxu0 %vm967_vm0, %v968_v1  ;;  %v684_v5 = vpack.c.bf16 %v271_v3, %v270_v2  ;;  %v273_v6 = vld [vmem:[#allocation5 + $0x18] sm:$0xff]  ;;  %v274_v8 = vld [vmem:[#allocation5 + $0x20] sm:$0xff]  ;;  %s576_s11 = sshll.u32 %s1021_s22, 7  ;;  %s268_s28 = scalar_lea.vmem [#allocation8], %s569_s13 }
  0x6d   : > { %707 = vmatprep.subr.bf16.mxu1 %v966_v0  ;;  %680 = vmatprep.mubr.msk.f32.mxu1 %vm967_vm0, %v968_v1  ;;  %v687_v7 = vpack.c.bf16 %v273_v6, %v272_v4  ;;  %v275_v9 = vld [vmem:[#allocation5 + $0x28] sm:$0xff]  ;;  %v364_v10 = vld [vmem:[#allocation7] sm:$0xff]  ;;  %v366_v12 = vld [vmem:[#allocation7 + $0x10] sm:$0xff]  ;;  %s472_s7 = sshll.u32 %s268_s28, 4  ;;  %s1206_s15 = scalar_lea.hbm %s1254_s5, %s576_s11  ;;  %s1208_s7 = int_to_ptr.vmem [resolvable:$true] %s472_s7 }
  0x6e   : > { %685 = vmatpush3.bf16.msra.mxu0 %v684_v5  ;;  %v365_v11 = vld [vmem:[#allocation7 + $0x8] sm:$0xff]  ;;  %v367_v13 = vld [vmem:[#allocation7 + $0x18] sm:$0xff]  ;;  %v690_v14 = vpack.c.bf16 %v275_v9, %v274_v8  ;;  %v276_v16 = vld [vmem:[#allocation5 + $0x30] sm:$0xff]  ;;  %s459_s16 = scalar_lea.sflag [#allocation4], %s1161_s12  ;;  %s889_s9 = scalar_lea.vmem %s1208_s7, 128 }
  0x6f   : > { %686 = vmatprep.subr.bf16.mxu0 %v966_v0  ;;  %v708_v15 = vpack.c.bf16 %v365_v11, %v364_v10  ;;  %v277_v17 = vld [vmem:[#allocation5 + $0x38] sm:$0xff]  ;;  %v711_v18 = vpack.c.bf16 %v367_v13, %v366_v12  ;;  %v368_v19 = vld [vmem:[#allocation7 + $0x20] sm:$0xff]  ;;  %v369_v20 = vld [vmem:[#allocation7 + $0x28] sm:$0xff]  ;;  %p890_p1 = scmp.ne.s32.totalorder %s1208_s7, %s889_s9  ;;  %s969_s22 = smov [#allocation8]  }
  0x70   : > { %v693_v21 = vpack.c.bf16 %v277_v17, %v276_v16  ;;  %v278_v22 = vld [vmem:[#allocation5 + $0x40] sm:$0xff]  ;;  %v279_v23 = vld [vmem:[#allocation5 + $0x48] sm:$0xff]  ;;  %v714_v24 = vpack.c.bf16 %v369_v20, %v368_v19  ;;  %v370_v25 = vld [vmem:[#allocation7 + $0x30] sm:$0xff]  ;;  %s893_s13 = sshll.u32 %s969_s22, 4  ;;  %s894_s13 = int_to_ptr.vmem [resolvable:$false] %s893_s13 }
  0x71   : > { %709 = vmatpush3.bf16.msra.mxu1 %v708_v15  ;;  %v371_v26 = vld [vmem:[#allocation7 + $0x38] sm:$0xff]  ;;  %v696_v27 = vpack.c.bf16 %v279_v23, %v278_v22  ;;  %v280_v28 = vld [vmem:[#allocation5 + $0x50] sm:$0xff]  ;;  %v372_v31 = vld [vmem:[#allocation7 + $0x40] sm:$0xff]  ;;  %p891_p2 = pnand %p890_p1, %p1112_p4  ;;  %s895_s29 = scalar_lea.vmem %s894_s13, 256 }
  0x72   : > { %688 = vmatpush3.bf16.msra.mxu0 %v687_v7  ;;  %710 = vmatprep.subr.bf16.mxu1 %v966_v0  ;;  %v281_v29 = vld [vmem:[#allocation5 + $0x58] sm:$0xff]  ;;  %v717_v30 = vpack.c.bf16 %v371_v26, %v370_v25  ;;  %v373_v32 = vld [vmem:[#allocation7 + $0x48] sm:$0xff]  ;;  %v282_v34 = vld [vmem:[#allocation5 + $0x60] sm:$0xff]  ;;  %p896_p8 = scmp.lt.s32.totalorder %s1208_s7, %s894_s13  ;;  %p897_p13 = scmp.lt.s32.totalorder %s895_s29, %s889_s9 }
  0x73   : > { %689 = vmatprep.subr.bf16.mxu0 %v966_v0  ;;  %v699_v33 = vpack.c.bf16 %v281_v29, %v280_v28  ;;  %v283_v35 = vld [vmem:[#allocation5 + $0x68] sm:$0xff]  ;;  %v720_v36 = vpack.c.bf16 %v373_v32, %v372_v31  ;;  %v374_v37 = vld [vmem:[#allocation7 + $0x50] sm:$0xff]  ;;  %v375_v38 = vld [vmem:[#allocation7 + $0x58] sm:$0xff]  ;;  %p892_p6 = pneg %p891_p2 }
  0x74   : > { %v702_v39 = vpack.c.bf16 %v283_v35, %v282_v34  ;;  %v284_v40 = vld [vmem:[#allocation5 + $0x70] sm:$0xff]  ;;  %v285_v41 = vld [vmem:[#allocation5 + $0x78] sm:$0xff]  ;;  %v723_v42 = vpack.c.bf16 %v375_v38, %v374_v37  ;;  %v376_v43 = vld [vmem:[#allocation7 + $0x60] sm:$0xff]  ;;  %p898_p3 = por %p897_p13, %p896_p8 }
  0x75   : > { %712 = vmatpush3.bf16.msra.mxu1 %v711_v18  ;;  %v377_v44 = vld [vmem:[#allocation7 + $0x68] sm:$0xff]  ;;  %v705_v45 = vpack.c.bf16 %v285_v41, %v284_v40  ;;  %v269_v47 = vld [vmem:[%s1167_s17] sm:$0xff] }
  0x76   : > { %691 = vmatpush3.bf16.msra.mxu0 %v690_v14  ;;  %713 = vmatprep.subr.bf16.mxu1 %v966_v0  ;;  %v726_v46 = vpack.c.bf16 %v377_v44, %v376_v43  ;;  %v378_v48 = vld [vmem:[#allocation7 + $0x70] sm:$0xff]  ;;  %v379_v49 = vld [vmem:[#allocation7 + $0x78] sm:$0xff]  ;;  %p899_p7 = pnand %p898_p3, %p892_p6 }
  0x77   : > { %692 = vmatprep.subr.bf16.mxu0 %v966_v0  ;;  %v729_v50 = vpack.c.bf16 %v379_v49, %v378_v48  ;;  %v573_v51 = vld [vmem:[%s1251_s2] ss:$0 sm:$0xff] }
  0x78   : > { %v574_v56 = vld [vmem:[%s1253_s4] ss:$0 sm:$0xff] }
  0x79   : > { %715 = vmatpush3.bf16.msra.mxu1 %v714_v24 }
  0x7a   : > { %694 = vmatpush3.bf16.msra.mxu0 %v693_v21  ;;  %716 = vmatprep.subr.bf16.mxu1 %v966_v0 }
  0x7b   : > { %695 = vmatprep.subr.bf16.mxu0 %v966_v0 }
  0x7d   : > { %718 = vmatpush3.bf16.msra.mxu1 %v717_v30 }
  0x7e   : > { %697 = vmatpush3.bf16.msra.mxu0 %v696_v27  ;;  %719 = vmatprep.subr.bf16.mxu1 %v966_v0 }
  0x7f   : > { %698 = vmatprep.subr.bf16.mxu0 %v966_v0 }
  0x81   : > { %721 = vmatpush3.bf16.msra.mxu1 %v720_v36 }
  0x82   : > { %700 = vmatpush3.bf16.msra.mxu0 %v699_v33  ;;  %722 = vmatprep.subr.bf16.mxu1 %v966_v0 }
  0x83   : > { %701 = vmatprep.subr.bf16.mxu0 %v966_v0 }
  0x85   : > { %724 = vmatpush3.bf16.msra.mxu1 %v723_v42 }
  0x86   : > { %703 = vmatpush3.bf16.msra.mxu0 %v702_v39  ;;  %725 = vmatprep.subr.bf16.mxu1 %v966_v0 }
  0x87   : > { %704 = vmatprep.subr.bf16.mxu0 %v966_v0 }
  0x89   : > { %727 = vmatpush3.bf16.msra.mxu1 %v726_v46 }
  0x8a   : > { %706 = vmatpush3.bf16.msra.mxu0 %v705_v45  ;;  %728 = vmatprep.subr.bf16.mxu1 %v966_v0 }
  0x8d   : > { %646 = vmatmul.mubr.f32.vlgmr.msra.gmra.mrb[0].mxu0 %v269_v47  ;;  %730 = vmatpush3.bf16.msra.mxu1 %v729_v50 }
 0x160   : > { %v359_v52 = vpop.f32.mrb[0].mxu0 }
 0x161   : > { %v360_v53 = vadd.f32 %v573_v51, %v359_v52  ;;  %v647_v54 = vpop.f32.mrb[1].mxu0 }
 0x163   : > { %v363_v55 = vmax.f32 %v360_v53, 0.0 }
 0x165   : > { %681 = vmatmul.mubr.f32.vlgmr.msra.gmra.mrb[0].mxu1 %v363_v55 }
 0x238   : > { %v453_v57 = vpop.f32.mrb[0].mxu1 }
 0x239   : > { %v454_v58 = vadd.f32 %v574_v56, %v453_v57  ;;  %v682_v59 = vpop.f32.mrb[1].mxu1 }
 0x23b   : > { %457 = vst [vmem:[%s268_s28] sm:$0xff] %v454_v58 }
 0x23c   : > { %902 = shalt.err (!%p899_p7)
}
 0x23d   : > { %s903_s12 = scalar_lea.hbm %s1206_s15, 128  ;;  %s907_s26 = scalar_lea.hbm %s1254_s5, 512 }
 0x23e   : > { %p904_p9 = scmp.ne.s32.totalorder %s1206_s15, %s903_s12  ;;  %p908_p0 = scmp.lt.u32.totalorder %s1206_s15, %s1254_s5 }
 0x23f   : > { %p909_p10 = scmp.lt.u32.totalorder %s907_s26, %s903_s12  ;;  %p911_p1 = scmp.lt.u32.totalorder %s903_s12, %s1206_s15 }
 0x240   : > { %p905_p12 = pnand %p904_p9, %p1112_p4 }
 0x241   : > { %p910_p11 = por %p909_p10, %p908_p0 }
 0x242   : > { %p906_p5 = pneg %p905_p12 }
 0x243   : > { %p912_p2 = por %p911_p1, %p910_p11 }
 0x245   : > { %p913_p6 = pnand %p912_p2, %p906_p5 }
 0x247   : > { %916 = shalt.err (!%p913_p6)
}
 0x248   : > { %741 = dma.vmem_to_hbm [thread:$0]  (%p1112_p4), %s1208_s7, 128, %s1206_s15, %s459_s16  }
 0x249 PF: > { %p763_p8 = scmp.ge.s32.totalorder %s959_s21, 2  ;;  %s484_s11 = sand.u32 1, %s947_s18  }
 0x24a   : > { %p1269_p13 = scmp.ne.s32.totalorder %s1259_s25, 0  ;;  %s485_s28 = scalar_lea.sflag [#allocation4], %s484_s11 }
 0x24c   : > { %p755_p3 = pnand %p763_p8, %p1269_p13 }
 0x24e   : > { %942 = dma.done.wait (!%p755_p3), %s485_s28, 128  }
 0x24f   : > { %944 = vsyncadd (!%p755_p3), %s485_s28, 4294967168  ;;  %p19_p7 = scmp.ge.s32.totalorder %s1102_s14, 6   ;;  %s1270_s18 = smov %s951_s19 }
 0x250   : > { %s1271_s19 = smov %s955_s20  ;;  %s1272_s20 = smov %s1118_s27 }
 0x251   : > { %s1273_s21 = smov %s1102_s14  ;;  %21 = sbr.rel (!%p19_p7) target bundleno = 6 (0x6), region = 93 }
 0x258   :  { %490 = vsyncpa [#allocation3], 1 }
 0x259   :  { %492 = vsyncpa [#allocation3 + $0x1], 1 }
 0x25a   :  { %493 = vsyncpa [#allocation6], 1 }
 0x25b   :  { %494 = vsyncpa [#allocation4], 1 }
 0x25c   :  { %496 = vsyncpa [#allocation4 + $0x1], 1 }

// kernel: tpu_custom_call.1
= control target key start
LH: loop header
LB: loop body
LE: loop exit
PB: predicated region body
PF: predicated region fallthrough
CT: control target
= control target key end

     0   :  { %10 = vsyncpa [#allocation3], 0  ;;  %s1249_s0 = inlined_call_operand.hbm [shape: f32[32,128], index: 0, kind: input, shape index: {}]   ;;  %s1250_s1 = inlined_call_operand.hbm [shape: f32[128,128], index: 1, kind: input, shape index: {}]   ;;  %s1251_s2 = inlined_call_operand.vmem [shape: f32[1,128], index: 2, kind: input, shape index: {}]   ;;  %s1252_s3 = inlined_call_operand.hbm [shape: f32[128,128], index: 3, kind: input, shape index: {}]   ;;  %s1253_s4 = inlined_call_operand.vmem [shape: f32[1,128], index: 4, kind: input, shape index: {}]   ;;  %s1254_s5 = inlined_call_operand.hbm [shape: f32[32,128], index: 5, kind: output, shape index: {}]  }
   0x1   :  { %12 = vsyncpa [#allocation3 + $0x1], 0 }
   0x2   :  { %13 = vsyncpa [#allocation6], 0 }
   0x3   :  { %14 = vsyncpa [#allocation4], 0 }
   0x4   :  { %16 = vsyncpa [#allocation4 + $0x1], 0  ;;  %s1000_s18 = smov 0   ;;  %s1002_s19 = smov 0  }
   0x5   :  { %s1004_s20 = smov 0   ;;  %s1006_s21 = smov 0  }
   0x6 LB: > { %s1021_s22 = sadd.s32 4294967295, %s959_s21   ;;  %s561_s23 = sadd.s32 4294967294, %s959_s21   ;;  %s959_s21 = sphi %s1006_s21, %s1273_s21   ;;  %s955_s20 = sphi %s1004_s20, %s1272_s20   ;;  %s951_s19 = sphi %s1002_s19, %s1271_s19   ;;  %s947_s18 = sphi %s1000_s18, %s1270_s18  }
   0x7   : > { %p42_p0 = scmp.ne.s32.totalorder %s951_s19, %s947_s18  ;;  %p1255_p1 = scmp.eq.s32.totalorder %s1021_s22, 0 }
   0x8   : > { %p156_p3 = scmp.eq.s32.totalorder %s561_s23, 3  ;;  %p562_p5 = scmp.ge.s32.totalorder %s959_s21, 1 }
   0x9   : > { %p1030_p4 = por %p1255_p1, %p42_p0  ;;  %p163_p7 = scmp.lt.s32.totalorder %s959_s21, 5 }
   0xa   : > { %p1035_p6 = por %p156_p3, %p42_p0  ;;  %s961_s27 = smov [#allocation5]  }
   0xb   : > { %s1258_s24 = scalar_select %p1030_p4, 1, 0 }
   0xc   : > { %s1259_s25 = scalar_select %p1035_p6, 1, 0 }
   0xd   : > { %p1040_p8 = pnand %p562_p5, %p163_p7  ;;  %s175_s28 = sshll.u32 %s961_s27, 4  ;;  %s176_s28 = int_to_ptr.vmem [resolvable:$true] %s175_s28 }
   0xe   : > { %s962_s30 = smov [#allocation7]   ;;  %s803_s9 = scalar_lea.hbm %s1250_s1, 2048 }
   0xf   : > { %s1260_s26 = scalar_select %p1040_p8, 1, 0 }
  0x10   : > { %p743_p9 = pneg %p1040_p8  ;;  %s191_s6 = sshll.u32 %s962_s30, 4  ;;  %s1052_s6 = int_to_ptr.vmem [resolvable:$true] %s191_s6 }
  0x11   : > { %p804_p11 = scmp.ne.s32.totalorder %s1250_s1, %s803_s9  ;;  %p810_p3 = scmp.lt.u32.totalorder %s803_s9, %s1250_s1 }
  0x12   : > { %p1048_p10 = pnand %p743_p9, %p1255_p1 }
  0x14   : > { %p805_p12 = pneg %p1048_p10 }
  0x16   : > { %p806_p13 = pnand %p805_p12, %p804_p11 }
  0x18   : > { %p807_p0 = pneg %p806_p13 }
  0x1a   : > { %p812_p5 = pnand %p810_p3, %p807_p0 }
  0x1c   : > { %815 = shalt.err (!%p812_p5)
}
  0x1d   : > { %s816_s14 = scalar_lea.vmem %s176_s28, 2048  ;;  %p824_p2 = scmp.lt.s32.totalorder %s176_s28, %s176_s28 }
  0x1e   : > { %p817_p7 = scmp.ne.s32.totalorder %s176_s28, %s816_s14  ;;  %p825_p6 = scmp.lt.s32.totalorder %s816_s14, %s816_s14 }
  0x20   : > { %p819_p9 = pnand %p817_p7, %p805_p12  ;;  %p826_p4 = por %p825_p6, %p824_p2 }
  0x22   : > { %p820_p1 = pneg %p819_p9 }
  0x24   : > { %p827_p8 = pnand %p826_p4, %p820_p1 }
  0x26   : > { %830 = shalt.err (!%p827_p8)
}
  0x27   : > { %s963_s15 = smov 128   ;;  %s964_s16 = smov 8  }
  0x28   : > { %746 = dma.hbm_to_vmem [thread:$0]  (!%p1048_p10), %s1250_s1, 2048, %s176_s28, [#allocation6], %s963_s15, %s963_s15, %s964_s16  }
  0x29   : > { %s831_s7 = scalar_lea.hbm %s1252_s3, 2048 }
  0x2a   : > { %p832_p11 = scmp.ne.s32.totalorder %s1252_s3, %s831_s7  ;;  %p838_p4 = scmp.lt.u32.totalorder %s831_s7, %s1252_s3 }
  0x2c   : > { %p834_p1 = pnand %p832_p11, %p805_p12 }
  0x2e   : > { %p835_p2 = pneg %p834_p1 }
  0x30   : > { %p840_p6 = pnand %p838_p4, %p835_p2 }
  0x32   : > { %843 = shalt.err (!%p840_p6)
}
  0x33   : > { %s844_s28 = scalar_lea.vmem %s1052_s6, 2048  ;;  %p852_p3 = scmp.lt.s32.totalorder %s1052_s6, %s1052_s6 }
  0x34   : > { %p845_p8 = scmp.ne.s32.totalorder %s1052_s6, %s844_s28  ;;  %p853_p5 = scmp.lt.s32.totalorder %s844_s28, %s844_s28 }
  0x36   : > { %p847_p13 = pnand %p845_p8, %p805_p12  ;;  %p854_p7 = por %p853_p5, %p852_p3 }
  0x38   : > { %p848_p0 = pneg %p847_p13 }
  0x3a   : > { %p855_p9 = pnand %p854_p7, %p848_p0 }
  0x3c   : > { %858 = shalt.err (!%p855_p9)
}
  0x3d   : > { %749 = dma.hbm_to_vmem [thread:$0]  (!%p1048_p10), %s1252_s3, 2048, %s1052_s6, [#allocation6], %s963_s15, %s963_s15, %s964_s16  }
  0x3e   : > { %s1102_s14 = sadd.s32 1, %s959_s21   ;;  %s29_s29 = sadd.s32 1, %s955_s20 }
  0x3f   : > { %s26_s17 = ssub.s32 %s959_s21, %s1102_s14  ;;  %p36_p12 = scmp.ne.s32.totalorder %s955_s20, %s951_s19 }
  0x40   : > { %p27_p11 = scmp.eq.s32.totalorder %s26_s17, 0  ;;  %p37_p1 = scmp.eq.s32.totalorder %s959_s21, 0 }
  0x41   : > { %p1262_p2 = scmp.eq.s32.totalorder %s1021_s22, 3  ;;  %p760_p6 = scmp.lt.s32.totalorder %s959_s21, 4 }
  0x42   : > { %s1118_s27 = scalar_select %p27_p11, %s955_s20, %s29_s29  }
  0x43   : > { %p1112_p4 = por %p1262_p2, %p36_p12  ;;  %p38_p8 = por %p37_p1, %p36_p12 }
  0x44   : > { %s208_s30 = sand.u32 1, %s955_s20   ;;  %s567_s6 = sshll.u32 %s959_s21, 7 }
  0x45   : > { %s566_s7 = sshll.u32 %s208_s30, 3  ;;  %s1125_s8 = scalar_lea.hbm %s1249_s0, %s567_s6 }
  0x46   : > { %s212_s9 = scalar_lea.vmem [#allocation2], %s566_s7  ;;  %p1129_p10 = pnand %p760_p6, %p38_p8 }
  0x47   : > { %s219_s10 = sshll.u32 %s212_s9, 4  ;;  %s209_s28 = scalar_lea.sflag [#allocation3], %s208_s30  ;;  %s1127_s10 = int_to_ptr.vmem [resolvable:$true] %s219_s10 }
  0x48   : > { %s859_s12 = scalar_lea.hbm %s1125_s8, 128  ;;  %p861_p0 = pneg %p1129_p10 }
  0x49   : > { %p860_p13 = scmp.ne.s32.totalorder %s1125_s8, %s859_s12  ;;  %s864_s17 = scalar_lea.hbm %s1249_s0, 512 }
  0x4a   : > { %p865_p7 = scmp.lt.u32.totalorder %s1125_s8, %s1249_s0  ;;  %p866_p9 = scmp.lt.u32.totalorder %s864_s17, %s859_s12 }
  0x4b   : > { %p862_p3 = pnand %p861_p0, %p860_p13  ;;  %p868_p11 = scmp.lt.u32.totalorder %s859_s12, %s1125_s8 }
  0x4c   : > { %p867_p12 = por %p866_p9, %p865_p7 }
  0x4d   : > { %p863_p5 = pneg %p862_p3 }
  0x4e   : > { %p869_p1 = por %p868_p11, %p867_p12 }
  0x50   : > { %p870_p2 = pnand %p869_p1, %p863_p5 }
  0x52   : > { %873 = shalt.err (!%p870_p2)
}
  0x53   : > { %s874_s30 = scalar_lea.vmem %s1127_s10, 128  ;;  %s965_s15 = smov [#allocation2]  }
  0x54   : > { %p875_p6 = scmp.ne.s32.totalorder %s1127_s10, %s874_s30  ;;  %s879_s16 = sshll.u32 %s965_s15, 4  ;;  %s880_s16 = int_to_ptr.vmem [resolvable:$false] %s879_s16 }
  0x55   : > { %s881_s9 = scalar_lea.vmem %s880_s16, 256  ;;  %p882_p3 = scmp.lt.s32.totalorder %s1127_s10, %s880_s16 }
  0x56   : > { %p877_p8 = pnand %p875_p6, %p861_p0  ;;  %p883_p7 = scmp.lt.s32.totalorder %s881_s9, %s874_s30 }
  0x58   : > { %p878_p13 = pneg %p877_p8  ;;  %p884_p9 = por %p883_p7, %p882_p3 }
  0x5a   : > { %p885_p12 = pnand %p884_p9, %p878_p13 }
  0x5c   : > { %888 = shalt.err (!%p885_p12)
}
  0x5d   : > { %753 = dma.hbm_to_vmem [thread:$0]  (!%p1129_p10), %s1125_s8, 128, %s1127_s10, %s209_s28  }
  0x5e   : > { %p1265_p5 = scmp.ne.s32.totalorder %s1260_s26, 0 }
  0x5f   : > { %s1161_s12 = sand.u32 (!%p1265_p5), 1, %s951_s19   ;;  %p1266_p0 = scmp.ne.s32.totalorder (!%p1265_p5), %s1258_s24, 0 }
  0x60   : > { %228 = sbr.rel (%p1265_p5) target bundleno = 585 (0x249), region = 40  ;;  %s569_s13 = sshll.u32 (!%p1265_p5), %s1161_s12, 3 }
  0x61   : > { %s231_s29 = scalar_lea.sflag (!%p1265_p5), [#allocation3], %s1161_s12  ;;  %s1167_s17 = scalar_lea.vmem (!%p1265_p5), [#allocation2], %s569_s13 }
  0x67   : > { %934 = dma.done.wait (%p1266_p0), %s231_s29, 128  }
  0x68   : > { %936 = vsyncadd (%p1266_p0), %s231_s29, 4294967168  ;;  %p1267_p10 = scmp.eq.s32.totalorder %s1021_s22, 0 }
  0x6a   : > { %938 = dma.done.wait (%p1267_p10), [#allocation6], 4096   ;;  %p1268_p11 = pmov %p1267_p10 }
  0x6b   : > { %v966_v0 = vmov 0.0|0.0   ;;  %vm967_vm0 = vmmov 0   ;;  %v968_v1 = vmov 0.0   ;;  %v270_v2 = vld [vmem:[#allocation5] sm:$0xff]  ;;  %v271_v3 = vld [vmem:[#allocation5 + $0x8] sm:$0xff]  ;;  %v272_v4 = vld [vmem:[#allocation5 + $0x10] sm:$0xff] }
  0x6c   : > { %940 = vsyncadd (%p1268_p11), [#allocation6], 4294963200  ;;  %683 = vmatprep.subr.bf16.mxu0 %v966_v0  ;;  %645 = vmatprep.mubr.msk.f32.mxu0 %vm967_vm0, %v968_v1  ;;  %v684_v5 = vpack.c.bf16 %v271_v3, %v270_v2  ;;  %v273_v6 = vld [vmem:[#allocation5 + $0x18] sm:$0xff]  ;;  %v274_v8 = vld [vmem:[#allocation5 + $0x20] sm:$0xff]  ;;  %s576_s11 = sshll.u32 %s1021_s22, 7  ;;  %s268_s28 = scalar_lea.vmem [#allocation8], %s569_s13 }
  0x6d   : > { %707 = vmatprep.subr.bf16.mxu1 %v966_v0  ;;  %680 = vmatprep.mubr.msk.f32.mxu1 %vm967_vm0, %v968_v1  ;;  %v687_v7 = vpack.c.bf16 %v273_v6, %v272_v4  ;;  %v275_v9 = vld [vmem:[#allocation5 + $0x28] sm:$0xff]  ;;  %v364_v10 = vld [vmem:[#allocation7] sm:$0xff]  ;;  %v366_v12 = vld [vmem:[#allocation7 + $0x10] sm:$0xff]  ;;  %s472_s7 = sshll.u32 %s268_s28, 4  ;;  %s1206_s15 = scalar_lea.hbm %s1254_s5, %s576_s11  ;;  %s1208_s7 = int_to_ptr.vmem [resolvable:$true] %s472_s7 }
  0x6e   : > { %685 = vmatpush3.bf16.msra.mxu0 %v684_v5  ;;  %v365_v11 = vld [vmem:[#allocation7 + $0x8] sm:$0xff]  ;;  %v367_v13 = vld [vmem:[#allocation7 + $0x18] sm:$0xff]  ;;  %v690_v14 = vpack.c.bf16 %v275_v9, %v274_v8  ;;  %v276_v16 = vld [vmem:[#allocation5 + $0x30] sm:$0xff]  ;;  %s459_s16 = scalar_lea.sflag [#allocation4], %s1161_s12  ;;  %s889_s9 = scalar_lea.vmem %s1208_s7, 128 }
  0x6f   : > { %686 = vmatprep.subr.bf16.mxu0 %v966_v0  ;;  %v708_v15 = vpack.c.bf16 %v365_v11, %v364_v10  ;;  %v277_v17 = vld [vmem:[#allocation5 + $0x38] sm:$0xff]  ;;  %v711_v18 = vpack.c.bf16 %v367_v13, %v366_v12  ;;  %v368_v19 = vld [vmem:[#allocation7 + $0x20] sm:$0xff]  ;;  %v369_v20 = vld [vmem:[#allocation7 + $0x28] sm:$0xff]  ;;  %p890_p1 = scmp.ne.s32.totalorder %s1208_s7, %s889_s9  ;;  %s969_s22 = smov [#allocation8]  }
  0x70   : > { %v693_v21 = vpack.c.bf16 %v277_v17, %v276_v16  ;;  %v278_v22 = vld [vmem:[#allocation5 + $0x40] sm:$0xff]  ;;  %v279_v23 = vld [vmem:[#allocation5 + $0x48] sm:$0xff]  ;;  %v714_v24 = vpack.c.bf16 %v369_v20, %v368_v19  ;;  %v370_v25 = vld [vmem:[#allocation7 + $0x30] sm:$0xff]  ;;  %s893_s13 = sshll.u32 %s969_s22, 4  ;;  %s894_s13 = int_to_ptr.vmem [resolvable:$false] %s893_s13 }
  0x71   : > { %709 = vmatpush3.bf16.msra.mxu1 %v708_v15  ;;  %v371_v26 = vld [vmem:[#allocation7 + $0x38] sm:$0xff]  ;;  %v696_v27 = vpack.c.bf16 %v279_v23, %v278_v22  ;;  %v280_v28 = vld [vmem:[#allocation5 + $0x50] sm:$0xff]  ;;  %v372_v31 = vld [vmem:[#allocation7 + $0x40] sm:$0xff]  ;;  %p891_p2 = pnand %p890_p1, %p1112_p4  ;;  %s895_s29 = scalar_lea.vmem %s894_s13, 256 }
  0x72   : > { %688 = vmatpush3.bf16.msra.mxu0 %v687_v7  ;;  %710 = vmatprep.subr.bf16.mxu1 %v966_v0  ;;  %v281_v29 = vld [vmem:[#allocation5 + $0x58] sm:$0xff]  ;;  %v717_v30 = vpack.c.bf16 %v371_v26, %v370_v25  ;;  %v373_v32 = vld [vmem:[#allocation7 + $0x48] sm:$0xff]  ;;  %v282_v34 = vld [vmem:[#allocation5 + $0x60] sm:$0xff]  ;;  %p896_p8 = scmp.lt.s32.totalorder %s1208_s7, %s894_s13  ;;  %p897_p13 = scmp.lt.s32.totalorder %s895_s29, %s889_s9 }
  0x73   : > { %689 = vmatprep.subr.bf16.mxu0 %v966_v0  ;;  %v699_v33 = vpack.c.bf16 %v281_v29, %v280_v28  ;;  %v283_v35 = vld [vmem:[#allocation5 + $0x68] sm:$0xff]  ;;  %v720_v36 = vpack.c.bf16 %v373_v32, %v372_v31  ;;  %v374_v37 = vld [vmem:[#allocation7 + $0x50] sm:$0xff]  ;;  %v375_v38 = vld [vmem:[#allocation7 + $0x58] sm:$0xff]  ;;  %p892_p6 = pneg %p891_p2 }
  0x74   : > { %v702_v39 = vpack.c.bf16 %v283_v35, %v282_v34  ;;  %v284_v40 = vld [vmem:[#allocation5 + $0x70] sm:$0xff]  ;;  %v285_v41 = vld [vmem:[#allocation5 + $0x78] sm:$0xff]  ;;  %v723_v42 = vpack.c.bf16 %v375_v38, %v374_v37  ;;  %v376_v43 = vld [vmem:[#allocation7 + $0x60] sm:$0xff]  ;;  %p898_p3 = por %p897_p13, %p896_p8 }
  0x75   : > { %712 = vmatpush3.bf16.msra.mxu1 %v711_v18  ;;  %v377_v44 = vld [vmem:[#allocation7 + $0x68] sm:$0xff]  ;;  %v705_v45 = vpack.c.bf16 %v285_v41, %v284_v40  ;;  %v269_v47 = vld [vmem:[%s1167_s17] sm:$0xff] }
  0x76   : > { %691 = vmatpush3.bf16.msra.mxu0 %v690_v14  ;;  %713 = vmatprep.subr.bf16.mxu1 %v966_v0  ;;  %v726_v46 = vpack.c.bf16 %v377_v44, %v376_v43  ;;  %v378_v48 = vld [vmem:[#allocation7 + $0x70] sm:$0xff]  ;;  %v379_v49 = vld [vmem:[#allocation7 + $0x78] sm:$0xff]  ;;  %p899_p7 = pnand %p898_p3, %p892_p6 }
  0x77   : > { %692 = vmatprep.subr.bf16.mxu0 %v966_v0  ;;  %v729_v50 = vpack.c.bf16 %v379_v49, %v378_v48  ;;  %v573_v51 = vld [vmem:[%s1251_s2] ss:$0 sm:$0xff] }
  0x78   : > { %v574_v56 = vld [vmem:[%s1253_s4] ss:$0 sm:$0xff] }
  0x79   : > { %715 = vmatpush3.bf16.msra.mxu1 %v714_v24 }
  0x7a   : > { %694 = vmatpush3.bf16.msra.mxu0 %v693_v21  ;;  %716 = vmatprep.subr.bf16.mxu1 %v966_v0 }
  0x7b   : > { %695 = vmatprep.subr.bf16.mxu0 %v966_v0 }
  0x7d   : > { %718 = vmatpush3.bf16.msra.mxu1 %v717_v30 }
  0x7e   : > { %697 = vmatpush3.bf16.msra.mxu0 %v696_v27  ;;  %719 = vmatprep.subr.bf16.mxu1 %v966_v0 }
  0x7f   : > { %698 = vmatprep.subr.bf16.mxu0 %v966_v0 }
  0x81   : > { %721 = vmatpush3.bf16.msra.mxu1 %v720_v36 }
  0x82   : > { %700 = vmatpush3.bf16.msra.mxu0 %v699_v33  ;;  %722 = vmatprep.subr.bf16.mxu1 %v966_v0 }
  0x83   : > { %701 = vmatprep.subr.bf16.mxu0 %v966_v0 }
  0x85   : > { %724 = vmatpush3.bf16.msra.mxu1 %v723_v42 }
  0x86   : > { %703 = vmatpush3.bf16.msra.mxu0 %v702_v39  ;;  %725 = vmatprep.subr.bf16.mxu1 %v966_v0 }
  0x87   : > { %704 = vmatprep.subr.bf16.mxu0 %v966_v0 }
  0x89   : > { %727 = vmatpush3.bf16.msra.mxu1 %v726_v46 }
  0x8a   : > { %706 = vmatpush3.bf16.msra.mxu0 %v705_v45  ;;  %728 = vmatprep.subr.bf16.mxu1 %v966_v0 }
  0x8d   : > { %646 = vmatmul.mubr.f32.vlgmr.msra.gmra.mrb[0].mxu0 %v269_v47  ;;  %730 = vmatpush3.bf16.msra.mxu1 %v729_v50 }
 0x160   : > { %v359_v52 = vpop.f32.mrb[0].mxu0 }
 0x161   : > { %v360_v53 = vadd.f32 %v573_v51, %v359_v52  ;;  %v647_v54 = vpop.f32.mrb[1].mxu0 }
 0x163   : > { %v363_v55 = vmax.f32 %v360_v53, 0.0 }
 0x165   : > { %681 = vmatmul.mubr.f32.vlgmr.msra.gmra.mrb[0].mxu1 %v363_v55 }
 0x238   : > { %v453_v57 = vpop.f32.mrb[0].mxu1 }
 0x239   : > { %v454_v58 = vadd.f32 %v574_v56, %v453_v57  ;;  %v682_v59 = vpop.f32.mrb[1].mxu1 }
 0x23b   : > { %457 = vst [vmem:[%s268_s28] sm:$0xff] %v454_v58 }
 0x23c   : > { %902 = shalt.err (!%p899_p7)
}
 0x23d   : > { %s903_s12 = scalar_lea.hbm %s1206_s15, 128  ;;  %s907_s26 = scalar_lea.hbm %s1254_s5, 512 }
 0x23e   : > { %p904_p9 = scmp.ne.s32.totalorder %s1206_s15, %s903_s12  ;;  %p908_p0 = scmp.lt.u32.totalorder %s1206_s15, %s1254_s5 }
 0x23f   : > { %p909_p10 = scmp.lt.u32.totalorder %s907_s26, %s903_s12  ;;  %p911_p1 = scmp.lt.u32.totalorder %s903_s12, %s1206_s15 }
 0x240   : > { %p905_p12 = pnand %p904_p9, %p1112_p4 }
 0x241   : > { %p910_p11 = por %p909_p10, %p908_p0 }
 0x242   : > { %p906_p5 = pneg %p905_p12 }
 0x243   : > { %p912_p2 = por %p911_p1, %p910_p11 }
 0x245   : > { %p913_p6 = pnand %p912_p2, %p906_p5 }
 0x247   : > { %916 = shalt.err (!%p913_p6)
}
 0x248   : > { %741 = dma.vmem_to_hbm [thread:$0]  (%p1112_p4), %s1208_s7, 128, %s1206_s15, %s459_s16  }
 0x249 PF: > { %p763_p8 = scmp.ge.s32.totalorder %s959_s21, 2  ;;  %s484_s11 = sand.u32 1, %s947_s18  }
 0x24a   : > { %p1269_p13 = scmp.ne.s32.totalorder %s1259_s25, 0  ;;  %s485_s28 = scalar_lea.sflag [#allocation4], %s484_s11 }
 0x24c   : > { %p755_p3 = pnand %p763_p8, %p1269_p13 }
 0x24e   : > { %942 = dma.done.wait (!%p755_p3), %s485_s28, 128  }
 0x24f   : > { %944 = vsyncadd (!%p755_p3), %s485_s28, 4294967168  ;;  %p19_p7 = scmp.ge.s32.totalorder %s1102_s14, 6   ;;  %s1270_s18 = smov %s951_s19 }
 0x250   : > { %s1271_s19 = smov %s955_s20  ;;  %s1272_s20 = smov %s1118_s27 }
 0x251   : > { %s1273_s21 = smov %s1102_s14  ;;  %21 = sbr.rel (!%p19_p7) target bundleno = 6 (0x6), region = 93 }
 0x258   :  { %490 = vsyncpa [#allocation3], 1 }
 0x259   :  { %492 = vsyncpa [#allocation3 + $0x1], 1 }
 0x25a   :  { %493 = vsyncpa [#allocation6], 1 }
 0x25b   :  { %494 = vsyncpa [#allocation4], 1 }
 0x25c   :  { %496 = vsyncpa [#allocation4 + $0x1], 1 }

</bundles_post_ra>
